<compile_context>
chip_gen: v6e
topology: v6e:2x2x1
jax: 0.10.0
libtpu: 0.0.40
codegen_flags: <defaults>
</compile_context>

<pallas_src>
import functools

import jax
import jax.numpy as jnp
import numpy as np
from jax.experimental import pallas as pl
from jax.experimental.pallas import tpu as pltpu

_RESIZE_DTYPE = jnp.bfloat16   # dtype feeding the MXU resize matmuls
_MASK_ZERO_EPS = 1e-6          # resized invalid-mask == 0 for fully valid pixels
_LANE_TARGET = 256             # MXU output-lane width on v6e/v7x (heuristic only)

# Flips to False automatically if pipeline_mode=pl.Buffered(1) is rejected.
_CONST_SINGLE_BUFFER = [True]


# ----------------------- trace-time (numpy) interp constants ----------------
def _bilinear_matrix_np(out_size: int, in_size: int) -> np.ndarray:
    """PyTorch F.interpolate(mode='bilinear', align_corners=False) along one
    axis, as an (out,in) matrix built with numpy at trace time."""
    scale = in_size / out_size
    dst = np.arange(out_size, dtype=np.float64)
    src = np.maximum((dst + 0.5) * scale - 0.5, 0.0)
    i0 = np.minimum(np.floor(src).astype(np.int64), in_size - 1)
    i1 = np.minimum(i0 + 1, in_size - 1)
    w1 = (src - i0).astype(np.float32)
    w0 = (1.0 - w1).astype(np.float32)
    m = np.zeros((out_size, in_size), dtype=np.float32)
    m[np.arange(out_size), i0] += w0
    m[np.arange(out_size), i1] += w1
    return m


@functools.lru_cache(maxsize=None)
def _interp_matrices(h, H, w, W):
    """(row-interp (h,H), transposed col-interp (W,w)) as f32 numpy (cached)."""
    r = _bilinear_matrix_np(h, H)
    ct = np.ascontiguousarray(_bilinear_matrix_np(w, W).T)
    return r, ct


@functools.lru_cache(maxsize=1)
def _vmem_limit_bytes():
    """Generation-dependent scoped-VMEM budget (~3/4 of physical, capped)."""
    cap = 0
    try:
        cap = int(getattr(pltpu.get_tpu_info(), "vmem_capacity_bytes", 0) or 0)
    except Exception:
        cap = 0
    if cap <= 0:
        return 48 * 1024 * 1024            # conservative fallback, safe on v7x
    return max(32 * 1024 * 1024, min(3 * cap // 4, 100 * 1024 * 1024))


def _compiler_params():
    # TODO(synk): use pltpu.CORE_PARALLEL on v7x (2 TCs) once verified; plain
    # "parallel" is harmless on the 1-TC parts.
    return pltpu.CompilerParams(dimension_semantics=("parallel",),
                                vmem_limit_bytes=_vmem_limit_bytes())


def _choose_col_first(h, H, w, W, planes, lane=_LANE_TARGET):
    """Static pass-order choice: FLOPs weighted by output-lane utilization."""
    def eff(m, k, n):
        return (m * k * n) / (min(n, lane) / float(lane))
    cost_col_first = eff(planes * H, W, w) + planes * eff(h, H, w)
    cost_row_first = planes * eff(h, H, W) + planes * eff(h, W, w)
    return cost_col_first <= cost_row_first


def _const_block_spec(shape, single_buffer):
    """BlockSpec for a grid-invariant operand (same block every grid step)."""
    index_map = lambda i: (0, 0)
    if single_buffer:
        # Index map is constant -> double-buffering buys nothing; halve VMEM.
        return pl.BlockSpec(shape, index_map, pipeline_mode=pl.Buffered(1))
    return pl.BlockSpec(shape, index_map)


def _elementwise_loss(diff, loss_type):
    if loss_type == "L1Loss":
        return jnp.abs(diff)
    if loss_type == "L2Loss":
        return diff * diff
    if loss_type == "HuberLoss":   # module's HuberLoss = 2 * smooth_l1(beta=1) * 1
        ad = jnp.abs(diff)
        return jnp.where(ad < 1.0, diff * diff, 2.0 * ad - 1.0)
    raise ValueError(loss_type)


# ----------------------------------- kernels --------------------------------
def _flow_loss_resize_kernel(est_ref, gts_ref, r_ref, ct_ref,
                             lsum_ref, cnt_ref, *, loss_type, n_ch, in_h,
                             col_first):
    """One batch element: bilinear resize of [flow channels | invalid-mask]
    via bf16 matmuls (de-kron'd), per-pixel loss, masked partial sums."""
    h, w = est_ref.shape[2], est_ref.shape[3]
    H = in_h
    n_planes = n_ch + 1

    r = r_ref[...]                 # (h, H)  resize dtype
    ct = ct_ref[...]               # (W, w)  resize dtype
    g = gts_ref[0]                 # (n_planes*H, W) resize dtype

    if col_first:
        # One fused lane-contraction matmul over the whole stacked block,
        # then small per-plane row matmuls (no zero-padded kron FLOPs).
        t = jnp.dot(g, ct, preferred_element_type=jnp.float32)        # (P*H, w)
        t = t.astype(ct.dtype)
        planes = [jnp.dot(r, t[p * H:(p + 1) * H, :],
                          preferred_element_type=jnp.float32)          # (h, w)
                  for p in range(n_planes)]
    else:
        # Row-first keeps the big first pass lane-dense (N = W).
        planes = []
        for p in range(n_planes):
            tp = jnp.dot(r, g[p * H:(p + 1) * H, :],
                         preferred_element_type=jnp.float32)           # (h, W)
            planes.append(jnp.dot(tp.astype(ct.dtype), ct,
                                  preferred_element_type=jnp.float32))  # (h, w)

    # Last plane is the resized INVALID mask (1 - mask): a destination pixel
    # is valid iff no invalid source pixel contributes with nonzero weight,
    # i.e. the resized value is exactly 0 (robust to bf16 weight rounding).
    valid = (planes[n_ch] <= _MASK_ZERO_EPS).astype(jnp.float32)

    loss_map = jnp.zeros((h, w), dtype=jnp.float32)
    for c in range(n_ch):          # static unroll (2 flow channels)
        diff = est_ref[0, c, :, :] - planes[c]
        loss_map = loss_map + _elementwise_loss(diff, loss_type)

    lsum = jnp.sum(loss_map * valid)
    cnt = jnp.sum(valid)
    # This grid step's own (1,1,1) output blocks (no read-modify-write).
    lsum_ref[...] = jnp.broadcast_to(lsum, lsum_ref.shape)
    cnt_ref[...] = jnp.broadcast_to(cnt, cnt_ref.shape)


def _flow_loss_same_kernel(est_ref, gt_ref, mask_ref, lsum_ref, cnt_ref, *,
                           loss_type):
    """Identity-resolution level: no resize matmuls, raw mask used directly
    (matches PyTorch, which skips interpolation when shapes already agree)."""
    n_ch = est_ref.shape[1]
    h, w = est_ref.shape[2], est_ref.shape[3]

    valid = (mask_ref[0] != 0).astype(jnp.float32)
    loss_map = jnp.zeros((h, w), dtype=jnp.float32)
    for c in range(n_ch):
        diff = est_ref[0, c, :, :] - gt_ref[0, c, :, :]
        loss_map = loss_map + _elementwise_loss(diff, loss_type)

    lsum = jnp.sum(loss_map * valid)
    cnt = jnp.sum(valid)
    lsum_ref[...] = jnp.broadcast_to(lsum, lsum_ref.shape)
    cnt_ref[...] = jnp.broadcast_to(cnt, cnt_ref.shape)


# ------------------------------ per-level wrappers ---------------------------
def _same_res_sums(est, gt, mask, loss_type):
    """(masked channel-summed loss sum, valid pixel count) at identity res."""
    b, c, H, W = est.shape
    mask_bf = mask.astype(jnp.bfloat16)    # quarter the mask DMA bytes vs f32
    kernel = functools.partial(_flow_loss_same_kernel, loss_type=loss_type)
    lsum, cnt = pl.pallas_call(
        kernel,
        out_shape=(jax.ShapeDtypeStruct((b, 1, 1), jnp.float32),
                   jax.ShapeDtypeStruct((b, 1, 1), jnp.float32)),
        grid=(b,),
        in_specs=[
            pl.BlockSpec((1, c, H, W), lambda i: (i, 0, 0, 0)),
            pl.BlockSpec((1, c, H, W), lambda i: (i, 0, 0, 0)),
            pl.BlockSpec((1, H, W), lambda i: (i, 0, 0)),
        ],
        out_specs=(pl.BlockSpec((1, 1, 1), lambda i: (i, 0, 0)),
                   pl.BlockSpec((1, 1, 1), lambda i: (i, 0, 0))),
        compiler_params=_compiler_params(),
    )(est, gt, mask_bf)
    return jnp.sum(lsum), jnp.sum(cnt)


def _resize_level_sums(est, gts_stack, gt_hw, loss_type):
    """(masked loss sum, valid pixel count) for a level that needs gt resize.
    gts_stack: (b, (c+1)*H, W) resize-dtype slab [flow channels | 1-mask]."""
    b, c, h, w = est.shape
    H, W = gt_hw
    planes = c + 1

    r_np, ct_np = _interp_matrices(h, H, w, W)
    r = jnp.asarray(r_np, dtype=_RESIZE_DTYPE)      # (h, H)
    ct = jnp.asarray(ct_np, dtype=_RESIZE_DTYPE)    # (W, w)
    col_first = _choose_col_first(h, H, w, W, planes)

    kernel = functools.partial(_flow_loss_resize_kernel, loss_type=loss_type,
                               n_ch=c, in_h=H, col_first=col_first)
    out_shape = (jax.ShapeDtypeStruct((b, 1, 1), jnp.float32),
                 jax.ShapeDtypeStruct((b, 1, 1), jnp.float32))
    out_specs = (pl.BlockSpec((1, 1, 1), lambda i: (i, 0, 0)),
                 pl.BlockSpec((1, 1, 1), lambda i: (i, 0, 0)))

    while True:
        single = _CONST_SINGLE_BUFFER[0]
        try:
            lsum, cnt = pl.pallas_call(
                kernel,
                out_shape=out_shape,
                grid=(b,),
                in_specs=[
                    pl.BlockSpec((1, c, h, w), lambda i: (i, 0, 0, 0)),      # est
                    pl.BlockSpec((1, planes * H, W), lambda i: (i, 0, 0)),    # gt+invalid stack
                    _const_block_spec((h, H), single),                        # row interp
                    _const_block_spec((W, w), single),                        # col interp^T
                ],
                out_specs=out_specs,
                compiler_params=_compiler_params(),
            )(est, gts_stack, r, ct)
            return jnp.sum(lsum), jnp.sum(cnt)
        except Exception:
            if not single:
                raise
            _CONST_SINGLE_BUFFER[0] = False   # retry without pl.Buffered(1)


def multiscale_flow_loss(flow_output, gt_flow, mask=None, level_weights=None,
                         loss_type="L1Loss"):
    """JAX/Pallas equivalent of MultiScaleFlowLoss.forward
    (downsample_gt_flow=True, reduction='mean', non-probabilistic levels)."""
    if not isinstance(flow_output, (list, tuple)):
        flow_output = [flow_output]
    if not level_weights:
        level_weights = [1.0] * len(flow_output)
    assert len(level_weights) == len(flow_output)

    gt_flow = gt_flow.astype(jnp.float32)
    b, c, H, W = gt_flow.shape
    mask_is_seq = isinstance(mask, (list, tuple))

    def prep_mask(m):
        return jnp.ones((b, H, W), jnp.float32) if m is None else m

    def make_stack(m):
        # [flow channels | (1 - mask)] stacked along H; bf16 feeds the MXU.
        inval = (1.0 - m.astype(jnp.float32))[:, None]
        s = jnp.concatenate([gt_flow, inval], axis=1)
        return s.reshape(b, (c + 1) * H, W).astype(_RESIZE_DTYPE)

    shared_stack = None   # hoisted: built once, reused by all resize levels
    total = jnp.float32(0.0)
    for i, (est, wgt) in enumerate(zip(flow_output, level_weights)):
        if isinstance(est, tuple):
            # TODO(synk): probabilistic (flow, uncert) levels not implemented.
            raise NotImplementedError("probabilistic_one_scale not implemented")
        mask_i = prep_mask(mask[i] if mask_is_seq else mask)
        est = est.astype(jnp.float32)
        h, w = est.shape[-2:]

        if (h, w) == (H, W):
            lsum, cnt = _same_res_sums(est, gt_flow, mask_i, loss_type)
        else:
            if mask_is_seq:
                stack = make_stack(mask_i)          # per-level mask: rebuild
            else:
                if shared_stack is None:
                    shared_stack = make_stack(mask_i)
                stack = shared_stack
            lsum, cnt = _resize_level_sums(est, stack, (H, W), loss_type)

        # Equivalent of PyTorch's "if not torch.any(mask): return 0" per level.
        level = jnp.where(cnt > 0, lsum / jnp.maximum(cnt, 1.0), 0.0)
        total = total + jnp.float32(wgt) * level
    return total


# ------------------------------ pure-JAX reference --------------------------
def _ref_one_scale(est, gt, mask, loss_type):
    h, w = est.shape[-2:]
    H, W = gt.shape[-2:]
    if (h, w) == (H, W):
        gt_r = gt
        m = (mask != 0)[:, None]
    else:
        r_np, _ = _interp_matrices(h, H, w, W)
        R = jnp.asarray(r_np)
        C = jnp.asarray(_bilinear_matrix_np(w, W))
        gt_r = jnp.einsum("hH,bcHW,wW->bchw", R, gt, C)
        inval = jnp.einsum("hH,bHW,wW->bhw", R,
                           1.0 - mask.astype(jnp.float32), C)
        m = (inval <= _MASK_ZERO_EPS)[:, None]
    loss = jnp.sum(_elementwise_loss(est - gt_r, loss_type), axis=1,
                   keepdims=True)
    msum = jnp.sum(m)
    return jnp.where(msum > 0, jnp.sum(loss * m) / jnp.maximum(msum, 1), 0.0)


def _ref_multiscale(flow_output, gt_flow, mask, level_weights,
                    loss_type="L1Loss"):
    total = 0.0
    for est, wgt in zip(flow_output, level_weights):
        total = total + wgt * _ref_one_scale(est, gt_flow, mask, loss_type)
    return total


# ----------------------------------- main -----------------------------------
if __name__ == "__main__":
    key = jax.random.PRNGKey(0)
    k1, k2, k3, k4 = jax.random.split(key, 4)

    b, H, W = 2, 16, 16
    gt_flow = jax.random.normal(k1, (b, 2, H, W), dtype=jnp.float32)
    # pyramid: coarsest -> finest
    est_coarse = jax.random.normal(k2, (b, 2, H // 2, W // 2), dtype=jnp.float32)
    est_fine = jax.random.normal(k3, (b, 2, H, W), dtype=jnp.float32)
    mask = jax.random.uniform(k4, (b, H, W)) > 0.3   # bool valid mask

    flow_output = [est_coarse, est_fine]
    level_weights = [0.32, 0.08]

    loss = jax.block_until_ready(
        multiscale_flow_loss(flow_output, gt_flow, mask, level_weights, "L1Loss"))
    ref = _ref_multiscale(flow_output, gt_flow, mask, level_weights, "L1Loss")
    np.testing.assert_allclose(float(loss), float(ref), rtol=1e-2, atol=1e-3)

    loss_h = jax.block_until_ready(
        multiscale_flow_loss(flow_output, gt_flow, mask, level_weights, "HuberLoss"))
    ref_h = _ref_multiscale(flow_output, gt_flow, mask, level_weights, "HuberLoss")
    np.testing.assert_allclose(float(loss_h), float(ref_h), rtol=1e-2, atol=1e-3)

    print("KERNEL_OK")
</pallas_src>

<mosaic_0001>
module attributes {stable_mosaic.version = 11 : i64} {
  func.func @_flow_loss_resize_kernel(%arg0: i32, %arg1: memref<1x2x8x8xf32, #tpu.memory_space<vmem>>, %arg2: memref<1x48x16xbf16, #tpu.memory_space<vmem>>, %arg3: memref<8x16xbf16, #tpu.memory_space<vmem>>, %arg4: memref<16x8xbf16, #tpu.memory_space<vmem>>, %arg5: memref<1x1x1xf32, #tpu.memory_space<vmem>>, %arg6: memref<1x1x1xf32, #tpu.memory_space<vmem>>) attributes {dimension_semantics = [#tpu.dimension_semantics<parallel>], iteration_bounds = array<i64: 2>, scalar_prefetch = 0 : i64, scratch_operands = 0 : i64, tpu.core_type = #tpu.core_type<tc>, window_params = [{transform_indices = @transform_0, window_bounds = array<i64: 1, 2, 8, 8>}, {transform_indices = @transform_1, window_bounds = array<i64: 1, 48, 16>}, {pipeline_mode = #tpu.pipeline_mode<synchronous>, transform_indices = @transform_2, window_bounds = array<i64: 8, 16>}, {pipeline_mode = #tpu.pipeline_mode<synchronous>, transform_indices = @transform_3, window_bounds = array<i64: 16, 8>}, {transform_indices = @transform_4, window_bounds = array<i64: 1, 1, 1>}, {transform_indices = @transform_5, window_bounds = array<i64: 1, 1, 1>}]} {
    %c0 = arith.constant 0 : index
    %c0_0 = arith.constant 0 : index
    %0 = vector.load %arg3[%c0, %c0_0] : memref<8x16xbf16, #tpu.memory_space<vmem>>, vector<8x16xbf16>
    %c0_1 = arith.constant 0 : index
    %c0_2 = arith.constant 0 : index
    %1 = vector.load %arg4[%c0_1, %c0_2] : memref<16x8xbf16, #tpu.memory_space<vmem>>, vector<16x8xbf16>
    %c0_3 = arith.constant 0 : index
    %c0_4 = arith.constant 0 : index
    %c0_5 = arith.constant 0 : index
    %2 = vector.load %arg2[%c0_3, %c0_4, %c0_5] : memref<1x48x16xbf16, #tpu.memory_space<vmem>>, vector<1x48x16xbf16>
    %3 = vector.shape_cast %2 : vector<1x48x16xbf16> to vector<48x16xbf16>
    %4 = vector.extract_strided_slice %3 {offsets = [0, 0], sizes = [16, 16], strides = [1, 1]} : vector<48x16xbf16> to vector<16x16xbf16>
    %cst = arith.constant dense<0.000000e+00> : vector<8x16xf32>
    %5 = tpu.matmul %0, %4, %cst {dimension_numbers = #tpu.dot_dimension_numbers<[1], [0], [0], [1], [0, 0, 1, 1], [], []>} : vector<8x16xbf16>, vector<16x16xbf16>, vector<8x16xf32> -> vector<8x16xf32>
    %6 = arith.truncf %5 : vector<8x16xf32> to vector<8x16xbf16>
    %cst_6 = arith.constant dense<0.000000e+00> : vector<8x8xf32>
    %7 = tpu.matmul %6, %1, %cst_6 {dimension_numbers = #tpu.dot_dimension_numbers<[1], [0], [0], [1], [0, 0, 1, 1], [], []>} : vector<8x16xbf16>, vector<16x8xbf16>, vector<8x8xf32> -> vector<8x8xf32>
    %8 = vector.extract_strided_slice %3 {offsets = [16, 0], sizes = [16, 16], strides = [1, 1]} : vector<48x16xbf16> to vector<16x16xbf16>
    %cst_7 = arith.constant dense<0.000000e+00> : vector<8x16xf32>
    %9 = tpu.matmul %0, %8, %cst_7 {dimension_numbers = #tpu.dot_dimension_numbers<[1], [0], [0], [1], [0, 0, 1, 1], [], []>} : vector<8x16xbf16>, vector<16x16xbf16>, vector<8x16xf32> -> vector<8x16xf32>
    %10 = arith.truncf %9 : vector<8x16xf32> to vector<8x16xbf16>
    %cst_8 = arith.constant dense<0.000000e+00> : vector<8x8xf32>
    %11 = tpu.matmul %10, %1, %cst_8 {dimension_numbers = #tpu.dot_dimension_numbers<[1], [0], [0], [1], [0, 0, 1, 1], [], []>} : vector<8x16xbf16>, vector<16x8xbf16>, vector<8x8xf32> -> vector<8x8xf32>
    %12 = vector.extract_strided_slice %3 {offsets = [32, 0], sizes = [16, 16], strides = [1, 1]} : vector<48x16xbf16> to vector<16x16xbf16>
    %cst_9 = arith.constant dense<0.000000e+00> : vector<8x16xf32>
    %13 = tpu.matmul %0, %12, %cst_9 {dimension_numbers = #tpu.dot_dimension_numbers<[1], [0], [0], [1], [0, 0, 1, 1], [], []>} : vector<8x16xbf16>, vector<16x16xbf16>, vector<8x16xf32> -> vector<8x16xf32>
    %14 = arith.truncf %13 : vector<8x16xf32> to vector<8x16xbf16>
    %cst_10 = arith.constant dense<0.000000e+00> : vector<8x8xf32>
    %15 = tpu.matmul %14, %1, %cst_10 {dimension_numbers = #tpu.dot_dimension_numbers<[1], [0], [0], [1], [0, 0, 1, 1], [], []>} : vector<8x16xbf16>, vector<16x8xbf16>, vector<8x8xf32> -> vector<8x8xf32>
    %cst_11 = arith.constant 9.99999997E-7 : f32
    %16 = vector.broadcast %cst_11 : f32 to vector<8x8xf32>
    %17 = arith.cmpf ole, %15, %16 : vector<8x8xf32>
    %18 = arith.extui %17 : vector<8x8xi1> to vector<8x8xi32>
    %19 = arith.sitofp %18 : vector<8x8xi32> to vector<8x8xf32>
    %cst_12 = arith.constant 0.000000e+00 : f32
    %20 = vector.broadcast %cst_12 : f32 to vector<8x8xf32>
    %c0_13 = arith.constant 0 : index
    %c0_14 = arith.constant 0 : index
    %c0_15 = arith.constant 0 : index
    %c0_16 = arith.constant 0 : index
    %21 = vector.load %arg1[%c0_13, %c0_14, %c0_15, %c0_16] : memref<1x2x8x8xf32, #tpu.memory_space<vmem>>, vector<1x1x8x8xf32>
    %22 = vector.shape_cast %21 : vector<1x1x8x8xf32> to vector<8x8xf32>
    %23 = arith.subf %22, %7 : vector<8x8xf32>
    %24 = math.absf %23 : vector<8x8xf32>
    %25 = arith.addf %20, %24 : vector<8x8xf32>
    %c0_17 = arith.constant 0 : index
    %c1 = arith.constant 1 : index
    %c0_18 = arith.constant 0 : index
    %c0_19 = arith.constant 0 : index
    %26 = vector.load %arg1[%c0_17, %c1, %c0_18, %c0_19] : memref<1x2x8x8xf32, #tpu.memory_space<vmem>>, vector<1x1x8x8xf32>
    %27 = vector.shape_cast %26 : vector<1x1x8x8xf32> to vector<8x8xf32>
    %28 = arith.subf %27, %11 : vector<8x8xf32>
    %29 = math.absf %28 : vector<8x8xf32>
    %30 = arith.addf %25, %29 : vector<8x8xf32>
    %31 = arith.mulf %30, %19 : vector<8x8xf32>
    %32 = vector.shape_cast %31 : vector<8x8xf32> to vector<1x8x8xf32>
    %cst_20 = arith.constant dense<0.000000e+00> : vector<1xf32>
    %33 = vector.multi_reduction <add>, %32, %cst_20 [1, 2] : vector<1x8x8xf32> to vector<1xf32>
    %34 = vector.shape_cast %33 : vector<1xf32> to vector<1x1x1xf32>
    %35 = vector.extract %34[0, 0, 0] : f32 from vector<1x1x1xf32>
    %36 = vector.shape_cast %19 : vector<8x8xf32> to vector<1x8x8xf32>
    %cst_21 = arith.constant dense<0.000000e+00> : vector<1xf32>
    %37 = vector.multi_reduction <add>, %36, %cst_21 [1, 2] : vector<1x8x8xf32> to vector<1xf32>
    %38 = vector.shape_cast %37 : vector<1xf32> to vector<1x1x1xf32>
    %39 = vector.extract %38[0, 0, 0] : f32 from vector<1x1x1xf32>
    %40 = vector.broadcast %35 : f32 to vector<1x1x1xf32>
    %c0_22 = arith.constant 0 : index
    %c0_23 = arith.constant 0 : index
    %c0_24 = arith.constant 0 : index
    %41 = vector.load %arg5[%c0_22, %c0_23, %c0_24] : memref<1x1x1xf32, #tpu.memory_space<vmem>>, vector<1x1x1xf32>
    tpu.vector_store %arg5[%c0_22, %c0_23, %c0_24], %40 {strides = array<i32>} : memref<1x1x1xf32, #tpu.memory_space<vmem>>, vector<1x1x1xf32>,
    %42 = vector.broadcast %39 : f32 to vector<1x1x1xf32>
    %c0_25 = arith.constant 0 : index
    %c0_26 = arith.constant 0 : index
    %c0_27 = arith.constant 0 : index
    %43 = vector.load %arg6[%c0_25, %c0_26, %c0_27] : memref<1x1x1xf32, #tpu.memory_space<vmem>>, vector<1x1x1xf32>
    tpu.vector_store %arg6[%c0_25, %c0_26, %c0_27], %42 {strides = array<i32>} : memref<1x1x1xf32, #tpu.memory_space<vmem>>, vector<1x1x1xf32>,
    return
  }
  func.func @transform_0(%arg0: i32) -> (i32, i32, i32, i32) {
    %c0_i32 = arith.constant 0 : i32
    %c0_i32_0 = arith.constant 0 : i32
    %c0_i32_1 = arith.constant 0 : i32
    %c0_i32_2 = arith.constant 0 : i32
    return %arg0, %c0_i32, %c0_i32_0, %c0_i32_1 : i32, i32, i32, i32
  }
  func.func @transform_1(%arg0: i32) -> (i32, i32, i32) {
    %c0_i32 = arith.constant 0 : i32
    %c0_i32_0 = arith.constant 0 : i32
    %c0_i32_1 = arith.constant 0 : i32
    return %arg0, %c0_i32, %c0_i32_0 : i32, i32, i32
  }
  func.func @transform_2(%arg0: i32) -> (i32, i32) {
    %c0_i32 = arith.constant 0 : i32
    %c0_i32_0 = arith.constant 0 : i32
    %c0_i32_1 = arith.constant 0 : i32
    return %c0_i32, %c0_i32_0 : i32, i32
  }
  func.func @transform_3(%arg0: i32) -> (i32, i32) {
    %c0_i32 = arith.constant 0 : i32
    %c0_i32_0 = arith.constant 0 : i32
    %c0_i32_1 = arith.constant 0 : i32
    return %c0_i32, %c0_i32_0 : i32, i32
  }
  func.func @transform_4(%arg0: i32) -> (i32, i32, i32) {
    %c0_i32 = arith.constant 0 : i32
    %c0_i32_0 = arith.constant 0 : i32
    %c0_i32_1 = arith.constant 0 : i32
    return %arg0, %c0_i32, %c0_i32_0 : i32, i32, i32
  }
  func.func @transform_5(%arg0: i32) -> (i32, i32, i32) {
    %c0_i32 = arith.constant 0 : i32
    %c0_i32_0 = arith.constant 0 : i32
    %c0_i32_1 = arith.constant 0 : i32
    return %arg0, %c0_i32, %c0_i32_0 : i32, i32, i32
  }
}

module attributes {stable_mosaic.version = 11 : i64} {
  func.func @_flow_loss_resize_kernel(%arg0: i32, %arg1: memref<1x2x8x8xf32, #tpu.memory_space<vmem>>, %arg2: memref<1x48x16xbf16, #tpu.memory_space<vmem>>, %arg3: memref<8x16xbf16, #tpu.memory_space<vmem>>, %arg4: memref<16x8xbf16, #tpu.memory_space<vmem>>, %arg5: memref<1x1x1xf32, #tpu.memory_space<vmem>>, %arg6: memref<1x1x1xf32, #tpu.memory_space<vmem>>) attributes {dimension_semantics = [#tpu.dimension_semantics<parallel>], iteration_bounds = array<i64: 2>, scalar_prefetch = 0 : i64, scratch_operands = 0 : i64, tpu.core_type = #tpu.core_type<tc>, window_params = [{transform_indices = @transform_0, window_bounds = array<i64: 1, 2, 8, 8>}, {transform_indices = @transform_1, window_bounds = array<i64: 1, 48, 16>}, {pipeline_mode = #tpu.pipeline_mode<synchronous>, transform_indices = @transform_2, window_bounds = array<i64: 8, 16>}, {pipeline_mode = #tpu.pipeline_mode<synchronous>, transform_indices = @transform_3, window_bounds = array<i64: 16, 8>}, {transform_indices = @transform_4, window_bounds = array<i64: 1, 1, 1>}, {transform_indices = @transform_5, window_bounds = array<i64: 1, 1, 1>}]} {
    %c0 = arith.constant 0 : index
    %c0_0 = arith.constant 0 : index
    %0 = vector.load %arg3[%c0, %c0_0] : memref<8x16xbf16, #tpu.memory_space<vmem>>, vector<8x16xbf16>
    %c0_1 = arith.constant 0 : index
    %c0_2 = arith.constant 0 : index
    %1 = vector.load %arg4[%c0_1, %c0_2] : memref<16x8xbf16, #tpu.memory_space<vmem>>, vector<16x8xbf16>
    %c0_3 = arith.constant 0 : index
    %c0_4 = arith.constant 0 : index
    %c0_5 = arith.constant 0 : index
    %2 = vector.load %arg2[%c0_3, %c0_4, %c0_5] : memref<1x48x16xbf16, #tpu.memory_space<vmem>>, vector<1x48x16xbf16>
    %3 = vector.shape_cast %2 : vector<1x48x16xbf16> to vector<48x16xbf16>
    %4 = vector.extract_strided_slice %3 {offsets = [0, 0], sizes = [16, 16], strides = [1, 1]} : vector<48x16xbf16> to vector<16x16xbf16>
    %cst = arith.constant dense<0.000000e+00> : vector<8x16xf32>
    %5 = tpu.matmul %0, %4, %cst {dimension_numbers = #tpu.dot_dimension_numbers<[1], [0], [0], [1], [0, 0, 1, 1], [], []>} : vector<8x16xbf16>, vector<16x16xbf16>, vector<8x16xf32> -> vector<8x16xf32>
    %6 = arith.truncf %5 : vector<8x16xf32> to vector<8x16xbf16>
    %cst_6 = arith.constant dense<0.000000e+00> : vector<8x8xf32>
    %7 = tpu.matmul %6, %1, %cst_6 {dimension_numbers = #tpu.dot_dimension_numbers<[1], [0], [0], [1], [0, 0, 1, 1], [], []>} : vector<8x16xbf16>, vector<16x8xbf16>, vector<8x8xf32> -> vector<8x8xf32>
    %8 = vector.extract_strided_slice %3 {offsets = [16, 0], sizes = [16, 16], strides = [1, 1]} : vector<48x16xbf16> to vector<16x16xbf16>
    %cst_7 = arith.constant dense<0.000000e+00> : vector<8x16xf32>
    %9 = tpu.matmul %0, %8, %cst_7 {dimension_numbers = #tpu.dot_dimension_numbers<[1], [0], [0], [1], [0, 0, 1, 1], [], []>} : vector<8x16xbf16>, vector<16x16xbf16>, vector<8x16xf32> -> vector<8x16xf32>
    %10 = arith.truncf %9 : vector<8x16xf32> to vector<8x16xbf16>
    %cst_8 = arith.constant dense<0.000000e+00> : vector<8x8xf32>
    %11 = tpu.matmul %10, %1, %cst_8 {dimension_numbers = #tpu.dot_dimension_numbers<[1], [0], [0], [1], [0, 0, 1, 1], [], []>} : vector<8x16xbf16>, vector<16x8xbf16>, vector<8x8xf32> -> vector<8x8xf32>
    %12 = vector.extract_strided_slice %3 {offsets = [32, 0], sizes = [16, 16], strides = [1, 1]} : vector<48x16xbf16> to vector<16x16xbf16>
    %cst_9 = arith.constant dense<0.000000e+00> : vector<8x16xf32>
    %13 = tpu.matmul %0, %12, %cst_9 {dimension_numbers = #tpu.dot_dimension_numbers<[1], [0], [0], [1], [0, 0, 1, 1], [], []>} : vector<8x16xbf16>, vector<16x16xbf16>, vector<8x16xf32> -> vector<8x16xf32>
    %14 = arith.truncf %13 : vector<8x16xf32> to vector<8x16xbf16>
    %cst_10 = arith.constant dense<0.000000e+00> : vector<8x8xf32>
    %15 = tpu.matmul %14, %1, %cst_10 {dimension_numbers = #tpu.dot_dimension_numbers<[1], [0], [0], [1], [0, 0, 1, 1], [], []>} : vector<8x16xbf16>, vector<16x8xbf16>, vector<8x8xf32> -> vector<8x8xf32>
    %cst_11 = arith.constant 9.99999997E-7 : f32
    %16 = vector.broadcast %cst_11 : f32 to vector<8x8xf32>
    %17 = arith.cmpf ole, %15, %16 : vector<8x8xf32>
    %18 = arith.extui %17 : vector<8x8xi1> to vector<8x8xi32>
    %19 = arith.sitofp %18 : vector<8x8xi32> to vector<8x8xf32>
    %cst_12 = arith.constant 0.000000e+00 : f32
    %20 = vector.broadcast %cst_12 : f32 to vector<8x8xf32>
    %c0_13 = arith.constant 0 : index
    %c0_14 = arith.constant 0 : index
    %c0_15 = arith.constant 0 : index
    %c0_16 = arith.constant 0 : index
    %21 = vector.load %arg1[%c0_13, %c0_14, %c0_15, %c0_16] : memref<1x2x8x8xf32, #tpu.memory_space<vmem>>, vector<1x1x8x8xf32>
    %22 = vector.shape_cast %21 : vector<1x1x8x8xf32> to vector<8x8xf32>
    %23 = arith.subf %22, %7 : vector<8x8xf32>
    %24 = math.absf %23 : vector<8x8xf32>
    %25 = arith.addf %20, %24 : vector<8x8xf32>
    %c0_17 = arith.constant 0 : index
    %c1 = arith.constant 1 : index
    %c0_18 = arith.constant 0 : index
    %c0_19 = arith.constant 0 : index
    %26 = vector.load %arg1[%c0_17, %c1, %c0_18, %c0_19] : memref<1x2x8x8xf32, #tpu.memory_space<vmem>>, vector<1x1x8x8xf32>
    %27 = vector.shape_cast %26 : vector<1x1x8x8xf32> to vector<8x8xf32>
    %28 = arith.subf %27, %11 : vector<8x8xf32>
    %29 = math.absf %28 : vector<8x8xf32>
    %30 = arith.addf %25, %29 : vector<8x8xf32>
    %31 = arith.mulf %30, %19 : vector<8x8xf32>
    %32 = vector.shape_cast %31 : vector<8x8xf32> to vector<1x8x8xf32>
    %cst_20 = arith.constant dense<0.000000e+00> : vector<1xf32>
    %33 = vector.multi_reduction <add>, %32, %cst_20 [1, 2] : vector<1x8x8xf32> to vector<1xf32>
    %34 = vector.shape_cast %33 : vector<1xf32> to vector<1x1x1xf32>
    %35 = vector.extract %34[0, 0, 0] : f32 from vector<1x1x1xf32>
    %36 = vector.shape_cast %19 : vector<8x8xf32> to vector<1x8x8xf32>
    %cst_21 = arith.constant dense<0.000000e+00> : vector<1xf32>
    %37 = vector.multi_reduction <add>, %36, %cst_21 [1, 2] : vector<1x8x8xf32> to vector<1xf32>
    %38 = vector.shape_cast %37 : vector<1xf32> to vector<1x1x1xf32>
    %39 = vector.extract %38[0, 0, 0] : f32 from vector<1x1x1xf32>
    %40 = vector.broadcast %35 : f32 to vector<1x1x1xf32>
    %c0_22 = arith.constant 0 : index
    %c0_23 = arith.constant 0 : index
    %c0_24 = arith.constant 0 : index
    %41 = vector.load %arg5[%c0_22, %c0_23, %c0_24] : memref<1x1x1xf32, #tpu.memory_space<vmem>>, vector<1x1x1xf32>
    tpu.vector_store %arg5[%c0_22, %c0_23, %c0_24], %40 {strides = array<i32>} : memref<1x1x1xf32, #tpu.memory_space<vmem>>, vector<1x1x1xf32>,
    %42 = vector.broadcast %39 : f32 to vector<1x1x1xf32>
    %c0_25 = arith.constant 0 : index
    %c0_26 = arith.constant 0 : index
    %c0_27 = arith.constant 0 : index
    %43 = vector.load %arg6[%c0_25, %c0_26, %c0_27] : memref<1x1x1xf32, #tpu.memory_space<vmem>>, vector<1x1x1xf32>
    tpu.vector_store %arg6[%c0_25, %c0_26, %c0_27], %42 {strides = array<i32>} : memref<1x1x1xf32, #tpu.memory_space<vmem>>, vector<1x1x1xf32>,
    return
  }
  func.func @transform_0(%arg0: i32) -> (i32, i32, i32, i32) {
    %c0_i32 = arith.constant 0 : i32
    %c0_i32_0 = arith.constant 0 : i32
    %c0_i32_1 = arith.constant 0 : i32
    %c0_i32_2 = arith.constant 0 : i32
    return %arg0, %c0_i32, %c0_i32_0, %c0_i32_1 : i32, i32, i32, i32
  }
  func.func @transform_1(%arg0: i32) -> (i32, i32, i32) {
    %c0_i32 = arith.constant 0 : i32
    %c0_i32_0 = arith.constant 0 : i32
    %c0_i32_1 = arith.constant 0 : i32
    return %arg0, %c0_i32, %c0_i32_0 : i32, i32, i32
  }
  func.func @transform_2(%arg0: i32) -> (i32, i32) {
    %c0_i32 = arith.constant 0 : i32
    %c0_i32_0 = arith.constant 0 : i32
    %c0_i32_1 = arith.constant 0 : i32
    return %c0_i32, %c0_i32_0 : i32, i32
  }
  func.func @transform_3(%arg0: i32) -> (i32, i32) {
    %c0_i32 = arith.constant 0 : i32
    %c0_i32_0 = arith.constant 0 : i32
    %c0_i32_1 = arith.constant 0 : i32
    return %c0_i32, %c0_i32_0 : i32, i32
  }
  func.func @transform_4(%arg0: i32) -> (i32, i32, i32) {
    %c0_i32 = arith.constant 0 : i32
    %c0_i32_0 = arith.constant 0 : i32
    %c0_i32_1 = arith.constant 0 : i32
    return %arg0, %c0_i32, %c0_i32_0 : i32, i32, i32
  }
  func.func @transform_5(%arg0: i32) -> (i32, i32, i32) {
    %c0_i32 = arith.constant 0 : i32
    %c0_i32_0 = arith.constant 0 : i32
    %c0_i32_1 = arith.constant 0 : i32
    return %arg0, %c0_i32, %c0_i32_0 : i32, i32, i32
  }
}

</mosaic_0001>

<bundles_post_ra>
// kernel: tpu_custom_call.1
= control target key start
LH: loop header
LB: loop body
LE: loop exit
PB: predicated region body
PF: predicated region fallthrough
CT: control target
= control target key end

     0   :  { %s793_s18 = smov 0   ;;  %s853_s0 = inlined_call_operand.vmem [shape: f32[2,2,8,8], index: 0, kind: input, shape index: {}]   ;;  %s854_s1 = inlined_call_operand.vmem [shape: bf16[2,48,16], index: 1, kind: input, shape index: {}]   ;;  %s855_s2 = inlined_call_operand.vmem [shape: bf16[8,16], index: 2, kind: input, shape index: {}]   ;;  %s856_s3 = inlined_call_operand.vmem [shape: bf16[16,8], index: 3, kind: input, shape index: {}]   ;;  %s857_s4 = inlined_call_operand.vmem [shape: f32[2,1,1], index: 4, kind: output, shape index: {0}]   ;;  %s858_s5 = inlined_call_operand.vmem [shape: f32[2,1,1], index: 5, kind: output, shape index: {1}]  }
   0x1 LB: > { %s663_s19 = sadd.s32 4294967295, %s759_s18   ;;  %p667_p0 = scmp.ge.s32.totalorder %s759_s18, 1  ;;  %s759_s18 = sphi %s793_s18, %s16_s18  }
   0x2   : > { %p200_p1 = scmp.lt.s32.totalorder %s759_s18, 3 }
   0x4   : > { %p201_p2 = pnand %p667_p0, %p200_p1 }
   0x5   : > { %p234_p3 = scmp.lt.s32.totalorder (!%p201_p2), %s663_s19, 1 }
   0x6   : > { %204 = sbr.rel (%p201_p2) target bundleno = 634 (0x27a), region = 36 }
   0xb   : > { %v761_v0 = vmov 0.0   ;;  %vm762_vm0 = vmmov 0   ;;  %s860_s19 = smov (!%p234_p3, %s663_s19), 1  ;;  %v251_v2 = vld [vmem:[%s855_s2] sm:$0xf]  ;;  %vm266_vm1 = vcmask 130048  }
   0xc   : > { %698 = vmatprep.subr.bf16.mxu0 %v761_v0  ;;  %700 = vmatprep.mubr.msk.bf16.mxu0 %vm762_vm0, %v761_v0  ;;  %s734_s20 = smul.u32 24, %s860_s19  ;;  %v752_v5 = vld [vmem:[%s856_s3] sm:$0xff]   ;;  %s685_s28 = sshll.u32 %s860_s19, 4  ;;  %vm553_vm3 = vcmask 64512   ;;  %vm575_vm4 = vcmask 0  }
   0xd   : > { %704 = vmatprep.subr.bf16.mxu1 %v761_v0  ;;  %706 = vmatprep.mubr.msk.bf16.mxu1 %vm762_vm0, %v761_v0  ;;  %s238_s6 = scalar_lea.vmem %s853_s0, %s685_s28  ;;  %s246_s9 = scalar_lea.vmem %s857_s4, %s860_s19 }
   0xe   : > { %s243_s23 = scalar_lea.vmem %s854_s1, %s734_s20  ;;  %705 = vmatpush3.bf16.msra.mxu1 %v752_v5  ;;  %v682_v25 = vld [vmem:[%s238_s6 + $0x8] sm:$0xff]  ;;  %v543_v26 = vld [vmem:[%s238_s6] sm:$0xff]  ;;  %s249_s13 = scalar_lea.vmem %s858_s5, %s860_s19 }
   0xf   : > { %v749_v1 = vld [vmem:[%s243_s23] sm:$0xff]   ;;  %v750_v3 = vld [vmem:[%s243_s23 + $0x8] sm:$0xff]   ;;  %v751_v4 = vld [vmem:[%s243_s23 + $0x10] sm:$0xff]   ;;  %716 = vmatprep.subr.bf16.mxu1 %v761_v0 }
  0x10   : > { %699 = vmatpush3.bf16.msra.mxu0 %v749_v1 }
  0x11   : > { %710 = vmatprep.subr.bf16.mxu0 %v761_v0 }
  0x13   : > { %701 = vmatmul.mubr.msk.bf16.vlgmr.msra.gmra.mxu0 %vm266_vm1, %v251_v2 }
  0x14   : > { %711 = vmatpush3.bf16.msra.mxu0 %v750_v3  ;;  %712 = vmatprep.mubr.msk.bf16.mxu0 %vm762_vm0, %v761_v0 }
  0x15   : > { %722 = vmatprep.subr.bf16.mxu0 %v761_v0 }
  0x1b   : > { %713 = vmatmul.mubr.msk.bf16.vlgmr.msra.gmra.mxu0 %vm266_vm1, %v251_v2 }
  0x1c   : > { %723 = vmatpush3.bf16.msra.mxu0 %v751_v4  ;;  %724 = vmatprep.mubr.msk.bf16.mxu0 %vm762_vm0, %v761_v0 }
  0x23   : > { %725 = vmatmul.mubr.msk.bf16.vlgmr.msra.gmra.mxu0 %vm266_vm1, %v251_v2 }
  0xd3   : > { %v304_v6 = vpop.f32.mrf.mxu0 }
  0xd4   : > { %v310_v7 = vpack.c.bf16 %v304_v6, %v304_v6 }
  0xd5   : > { %v702_v8 = vpop.f32.mrf.mxu0 }
  0xd6   : > { %707 = vmatmul.mubr.msk.bf16.vlgmr.msra.gmra.mxu1 %vm266_vm1, %v310_v7 }
  0xd7   : > { %v307_v9 = vpop.f32.mrf.mxu0  ;;  %717 = vmatpush3.bf16.msra.mxu1 %v752_v5  ;;  %718 = vmatprep.mubr.msk.bf16.mxu1 %vm762_vm0, %v761_v0 }
  0xd8   : > { %728 = vmatprep.subr.bf16.mxu1 %v761_v0 }
  0xd9   : > { %v703_v10 = vpop.f32.mrf.mxu0 }
  0xdb   : > { %v400_v11 = vpop.f32.mrf.mxu0 }
  0xdc   : > { %v406_v12 = vpack.c.bf16 %v400_v11, %v400_v11 }
  0xdd   : > { %v714_v13 = vpop.f32.mrf.mxu0 }
  0xde   : > { %719 = vmatmul.mubr.msk.bf16.vlgmr.msra.gmra.mxu1 %vm266_vm1, %v406_v12 }
  0xdf   : > { %v403_v14 = vpop.f32.mrf.mxu0  ;;  %729 = vmatpush3.bf16.msra.mxu1 %v752_v5  ;;  %730 = vmatprep.mubr.msk.bf16.mxu1 %vm762_vm0, %v761_v0 }
  0xe1   : > { %v715_v15 = vpop.f32.mrf.mxu0 }
  0xe3   : > { %v490_v16 = vpop.f32.mrf.mxu0 }
  0xe4   : > { %v496_v17 = vpack.c.bf16 %v490_v16, %v490_v16 }
  0xe5   : > { %v726_v18 = vpop.f32.mrf.mxu0 }
  0xe6   : > { %731 = vmatmul.mubr.msk.bf16.vlgmr.msra.gmra.mxu1 %vm266_vm1, %v496_v17 }
  0xe7   : > { %v493_v19 = vpop.f32.mrf.mxu0 }
  0xe9   : > { %v727_v20 = vpop.f32.mrf.mxu0 }
 0x196   : > { %v354_v21 = vpop.f32.mrf.mxu1 }
 0x197   : > { %v544_v30 = vsub.f32 %v543_v26, %v354_v21 }
 0x198   : > { %v708_v22 = vpop.f32.mrf.mxu1 }
 0x199   : > { %v545_v34 = vand.u32 2147483647, %v544_v30 }
 0x19a   : > { %v357_v23 = vpop.f32.mrf.mxu1 }
 0x19c   : > { %v709_v24 = vpop.f32.mrf.mxu1 }
 0x19e   : > { %v444_v27 = vpop.f32.mrf.mxu1 }
 0x19f   : > { %v549_v28 = vsub.f32 %v682_v25, %v444_v27 }
 0x1a0   : > { %v720_v29 = vpop.f32.mrf.mxu1 }
 0x1a1   : > { %v550_v32 = vand.u32 2147483647, %v549_v28 }
 0x1a2   : > { %v447_v31 = vpop.f32.mrf.mxu1 }
 0x1a3   : > { %v551_v36 = vadd.f32 %v550_v32, %v545_v34 }
 0x1a4   : > { %v721_v33 = vpop.f32.mrf.mxu1 }
 0x1a6   : > { %v534_v35 = vpop.f32.mrf.mxu1 }
 0x1a7   : > { %vm540_vm2 = vcmp.le.f32.partialorder %v534_v35, 1e-06 }
 0x1a8   : > { %v681_v37 = vsel %vm540_vm2, 1.0, %v761_v0  ;;  %v732_v38 = vpop.f32.mrf.mxu1 }
 0x1a9   : > { %v552_v39 = vmul.f32 %v681_v37, %v551_v36  ;;  %v564_v43 = vsel %vm553_vm3, %v681_v37, 0.0 }
 0x1aa   : > { %v537_v40 = vpop.f32.mrf.mxu1 }
 0x1ab   : > { %v554_v41 = vsel %vm553_vm3, %v552_v39, 0.0 }
 0x1ac   : > { %v733_v42 = vpop.f32.mrf.mxu1  ;;  %555 = vadd.xlane.f32.xlu0 %v554_v41 }
 0x1b0   : > { %565 = vadd.xlane.f32.xlu0 %v564_v43 }
 0x235   : > { %v556_v44 = vpop.xlane.xlu0 %555 }
 0x236   : > { %v557_v45 = vrot.slane %v556_v44, 4 }
 0x238   : > { %v558_v46 = vadd.f32 %v557_v45, %v556_v44 }
 0x239   : > { %v566_v47 = vpop.xlane.xlu0 %565 }
 0x23a   : > { %v559_v48 = vrot.slane %v558_v46, 2  ;;  %v567_v49 = vrot.slane %v566_v47, 4 }
 0x23c   : > { %v568_v50 = vadd.f32 %v567_v49, %v566_v47  ;;  %v560_v51 = vadd.f32 %v559_v48, %v558_v46 }
 0x23e   : > { %v569_v52 = vrot.slane %v568_v50, 2  ;;  %v561_v53 = vrot.slane %v560_v51, 1 }
 0x240   : > { %v570_v54 = vadd.f32 %v569_v52, %v568_v50  ;;  %v562_v55 = vadd.f32 %v561_v53, %v560_v51 }
 0x242   : > { %735 = vpush %v562_v55  ;;  %v571_v56 = vrot.slane %v570_v54, 1 }
 0x244   : > { %v572_v57 = vadd.f32 %v571_v56, %v570_v54 }
 0x246   : > { %737 = vpush %v572_v57 }
 0x273   : > { %s736_s10 = spop %735 }
 0x274   : > { %v574_v58 = vstv %s736_s10 }
 0x275   : > { %576 = vst.msk [vmem:[%s246_s9] sm:$0x1] %vm575_vm4, %v574_v58 }
 0x277   : > { %s738_s14 = spop %737 }
 0x278   : > { %v577_v59 = vstv %s738_s14 }
 0x279   : > { %578 = vst.msk [vmem:[%s249_s13] sm:$0x1] %vm575_vm4, %v577_v59 }
 0x27a PF: > { %s16_s18 = sadd.s32 1, %s759_s18  }
 0x27b   : > { %p13_p4 = scmp.ge.s32.totalorder %s16_s18, 4  }
 0x27d   :  { %15 = sbr.rel (!%p13_p4) target bundleno = 1 (0x1), region = 82 }

// kernel: tpu_custom_call.1
= control target key start
LH: loop header
LB: loop body
LE: loop exit
PB: predicated region body
PF: predicated region fallthrough
CT: control target
= control target key end

     0   :  { %s793_s18 = smov 0   ;;  %s853_s0 = inlined_call_operand.vmem [shape: f32[2,2,8,8], index: 0, kind: input, shape index: {}]   ;;  %s854_s1 = inlined_call_operand.vmem [shape: bf16[2,48,16], index: 1, kind: input, shape index: {}]   ;;  %s855_s2 = inlined_call_operand.vmem [shape: bf16[8,16], index: 2, kind: input, shape index: {}]   ;;  %s856_s3 = inlined_call_operand.vmem [shape: bf16[16,8], index: 3, kind: input, shape index: {}]   ;;  %s857_s4 = inlined_call_operand.vmem [shape: f32[2,1,1], index: 4, kind: output, shape index: {0}]   ;;  %s858_s5 = inlined_call_operand.vmem [shape: f32[2,1,1], index: 5, kind: output, shape index: {1}]  }
   0x1 LB: > { %s663_s19 = sadd.s32 4294967295, %s759_s18   ;;  %p667_p0 = scmp.ge.s32.totalorder %s759_s18, 1  ;;  %s759_s18 = sphi %s793_s18, %s16_s18  }
   0x2   : > { %p200_p1 = scmp.lt.s32.totalorder %s759_s18, 3 }
   0x4   : > { %p201_p2 = pnand %p667_p0, %p200_p1 }
   0x5   : > { %p234_p3 = scmp.lt.s32.totalorder (!%p201_p2), %s663_s19, 1 }
   0x6   : > { %204 = sbr.rel (%p201_p2) target bundleno = 634 (0x27a), region = 36 }
   0xb   : > { %v761_v0 = vmov 0.0   ;;  %vm762_vm0 = vmmov 0   ;;  %s860_s19 = smov (!%p234_p3, %s663_s19), 1  ;;  %v251_v2 = vld [vmem:[%s855_s2] sm:$0xf]  ;;  %vm266_vm1 = vcmask 130048  }
   0xc   : > { %698 = vmatprep.subr.bf16.mxu0 %v761_v0  ;;  %700 = vmatprep.mubr.msk.bf16.mxu0 %vm762_vm0, %v761_v0  ;;  %s734_s20 = smul.u32 24, %s860_s19  ;;  %v752_v5 = vld [vmem:[%s856_s3] sm:$0xff]   ;;  %s685_s28 = sshll.u32 %s860_s19, 4  ;;  %vm553_vm3 = vcmask 64512   ;;  %vm575_vm4 = vcmask 0  }
   0xd   : > { %704 = vmatprep.subr.bf16.mxu1 %v761_v0  ;;  %706 = vmatprep.mubr.msk.bf16.mxu1 %vm762_vm0, %v761_v0  ;;  %s238_s6 = scalar_lea.vmem %s853_s0, %s685_s28  ;;  %s246_s9 = scalar_lea.vmem %s857_s4, %s860_s19 }
   0xe   : > { %s243_s23 = scalar_lea.vmem %s854_s1, %s734_s20  ;;  %705 = vmatpush3.bf16.msra.mxu1 %v752_v5  ;;  %v682_v25 = vld [vmem:[%s238_s6 + $0x8] sm:$0xff]  ;;  %v543_v26 = vld [vmem:[%s238_s6] sm:$0xff]  ;;  %s249_s13 = scalar_lea.vmem %s858_s5, %s860_s19 }
   0xf   : > { %v749_v1 = vld [vmem:[%s243_s23] sm:$0xff]   ;;  %v750_v3 = vld [vmem:[%s243_s23 + $0x8] sm:$0xff]   ;;  %v751_v4 = vld [vmem:[%s243_s23 + $0x10] sm:$0xff]   ;;  %716 = vmatprep.subr.bf16.mxu1 %v761_v0 }
  0x10   : > { %699 = vmatpush3.bf16.msra.mxu0 %v749_v1 }
  0x11   : > { %710 = vmatprep.subr.bf16.mxu0 %v761_v0 }
  0x13   : > { %701 = vmatmul.mubr.msk.bf16.vlgmr.msra.gmra.mxu0 %vm266_vm1, %v251_v2 }
  0x14   : > { %711 = vmatpush3.bf16.msra.mxu0 %v750_v3  ;;  %712 = vmatprep.mubr.msk.bf16.mxu0 %vm762_vm0, %v761_v0 }
  0x15   : > { %722 = vmatprep.subr.bf16.mxu0 %v761_v0 }
  0x1b   : > { %713 = vmatmul.mubr.msk.bf16.vlgmr.msra.gmra.mxu0 %vm266_vm1, %v251_v2 }
  0x1c   : > { %723 = vmatpush3.bf16.msra.mxu0 %v751_v4  ;;  %724 = vmatprep.mubr.msk.bf16.mxu0 %vm762_vm0, %v761_v0 }
  0x23   : > { %725 = vmatmul.mubr.msk.bf16.vlgmr.msra.gmra.mxu0 %vm266_vm1, %v251_v2 }
  0xd3   : > { %v304_v6 = vpop.f32.mrf.mxu0 }
  0xd4   : > { %v310_v7 = vpack.c.bf16 %v304_v6, %v304_v6 }
  0xd5   : > { %v702_v8 = vpop.f32.mrf.mxu0 }
  0xd6   : > { %707 = vmatmul.mubr.msk.bf16.vlgmr.msra.gmra.mxu1 %vm266_vm1, %v310_v7 }
  0xd7   : > { %v307_v9 = vpop.f32.mrf.mxu0  ;;  %717 = vmatpush3.bf16.msra.mxu1 %v752_v5  ;;  %718 = vmatprep.mubr.msk.bf16.mxu1 %vm762_vm0, %v761_v0 }
  0xd8   : > { %728 = vmatprep.subr.bf16.mxu1 %v761_v0 }
  0xd9   : > { %v703_v10 = vpop.f32.mrf.mxu0 }
  0xdb   : > { %v400_v11 = vpop.f32.mrf.mxu0 }
  0xdc   : > { %v406_v12 = vpack.c.bf16 %v400_v11, %v400_v11 }
  0xdd   : > { %v714_v13 = vpop.f32.mrf.mxu0 }
  0xde   : > { %719 = vmatmul.mubr.msk.bf16.vlgmr.msra.gmra.mxu1 %vm266_vm1, %v406_v12 }
  0xdf   : > { %v403_v14 = vpop.f32.mrf.mxu0  ;;  %729 = vmatpush3.bf16.msra.mxu1 %v752_v5  ;;  %730 = vmatprep.mubr.msk.bf16.mxu1 %vm762_vm0, %v761_v0 }
  0xe1   : > { %v715_v15 = vpop.f32.mrf.mxu0 }
  0xe3   : > { %v490_v16 = vpop.f32.mrf.mxu0 }
  0xe4   : > { %v496_v17 = vpack.c.bf16 %v490_v16, %v490_v16 }
  0xe5   : > { %v726_v18 = vpop.f32.mrf.mxu0 }
  0xe6   : > { %731 = vmatmul.mubr.msk.bf16.vlgmr.msra.gmra.mxu1 %vm266_vm1, %v496_v17 }
  0xe7   : > { %v493_v19 = vpop.f32.mrf.mxu0 }
  0xe9   : > { %v727_v20 = vpop.f32.mrf.mxu0 }
 0x196   : > { %v354_v21 = vpop.f32.mrf.mxu1 }
 0x197   : > { %v544_v30 = vsub.f32 %v543_v26, %v354_v21 }
 0x198   : > { %v708_v22 = vpop.f32.mrf.mxu1 }
 0x199   : > { %v545_v34 = vand.u32 2147483647, %v544_v30 }
 0x19a   : > { %v357_v23 = vpop.f32.mrf.mxu1 }
 0x19c   : > { %v709_v24 = vpop.f32.mrf.mxu1 }
 0x19e   : > { %v444_v27 = vpop.f32.mrf.mxu1 }
 0x19f   : > { %v549_v28 = vsub.f32 %v682_v25, %v444_v27 }
 0x1a0   : > { %v720_v29 = vpop.f32.mrf.mxu1 }
 0x1a1   : > { %v550_v32 = vand.u32 2147483647, %v549_v28 }
 0x1a2   : > { %v447_v31 = vpop.f32.mrf.mxu1 }
 0x1a3   : > { %v551_v36 = vadd.f32 %v550_v32, %v545_v34 }
 0x1a4   : > { %v721_v33 = vpop.f32.mrf.mxu1 }
 0x1a6   : > { %v534_v35 = vpop.f32.mrf.mxu1 }
 0x1a7   : > { %vm540_vm2 = vcmp.le.f32.partialorder %v534_v35, 1e-06 }
 0x1a8   : > { %v681_v37 = vsel %vm540_vm2, 1.0, %v761_v0  ;;  %v732_v38 = vpop.f32.mrf.mxu1 }
 0x1a9   : > { %v552_v39 = vmul.f32 %v681_v37, %v551_v36  ;;  %v564_v43 = vsel %vm553_vm3, %v681_v37, 0.0 }
 0x1aa   : > { %v537_v40 = vpop.f32.mrf.mxu1 }
 0x1ab   : > { %v554_v41 = vsel %vm553_vm3, %v552_v39, 0.0 }
 0x1ac   : > { %v733_v42 = vpop.f32.mrf.mxu1  ;;  %555 = vadd.xlane.f32.xlu0 %v554_v41 }
 0x1b0   : > { %565 = vadd.xlane.f32.xlu0 %v564_v43 }
 0x235   : > { %v556_v44 = vpop.xlane.xlu0 %555 }
 0x236   : > { %v557_v45 = vrot.slane %v556_v44, 4 }
 0x238   : > { %v558_v46 = vadd.f32 %v557_v45, %v556_v44 }
 0x239   : > { %v566_v47 = vpop.xlane.xlu0 %565 }
 0x23a   : > { %v559_v48 = vrot.slane %v558_v46, 2  ;;  %v567_v49 = vrot.slane %v566_v47, 4 }
 0x23c   : > { %v568_v50 = vadd.f32 %v567_v49, %v566_v47  ;;  %v560_v51 = vadd.f32 %v559_v48, %v558_v46 }
 0x23e   : > { %v569_v52 = vrot.slane %v568_v50, 2  ;;  %v561_v53 = vrot.slane %v560_v51, 1 }
 0x240   : > { %v570_v54 = vadd.f32 %v569_v52, %v568_v50  ;;  %v562_v55 = vadd.f32 %v561_v53, %v560_v51 }
 0x242   : > { %735 = vpush %v562_v55  ;;  %v571_v56 = vrot.slane %v570_v54, 1 }
 0x244   : > { %v572_v57 = vadd.f32 %v571_v56, %v570_v54 }
 0x246   : > { %737 = vpush %v572_v57 }
 0x273   : > { %s736_s10 = spop %735 }
 0x274   : > { %v574_v58 = vstv %s736_s10 }
 0x275   : > { %576 = vst.msk [vmem:[%s246_s9] sm:$0x1] %vm575_vm4, %v574_v58 }
 0x277   : > { %s738_s14 = spop %737 }
 0x278   : > { %v577_v59 = vstv %s738_s14 }
 0x279   : > { %578 = vst.msk [vmem:[%s249_s13] sm:$0x1] %vm575_vm4, %v577_v59 }
 0x27a PF: > { %s16_s18 = sadd.s32 1, %s759_s18  }
 0x27b   : > { %p13_p4 = scmp.ge.s32.totalorder %s16_s18, 4  }
 0x27d   :  { %15 = sbr.rel (!%p13_p4) target bundleno = 1 (0x1), region = 82 }

</bundles_post_ra>
